<compile_context>
chip_gen: v5e
topology: v5e:2x2
jax: 0.10.0
libtpu: 0.0.40
codegen_flags: <defaults>
</compile_context>

<pallas_src>
import functools
import math

import jax
import jax.numpy as jnp
from jax import lax
from jax.experimental import pallas as pl
from jax.experimental.pallas import tpu as pltpu

# Large finite negative used as the mask fill (standard flash-attention value).
# Fully-masked rows yield a uniform distribution instead of PyTorch's NaN rows.
DEFAULT_MASK_VALUE = -0.7 * float(jnp.finfo(jnp.float32).max)


def _flash_body(q_ref, k_ref, v_ref, mask_ref, o_ref, q_sc, m_sc, l_sc, acc_sc,
                *, scale, G, tq, tk, mask_mode):
    """One (head-group, q_tile) block; grid axis 2 iterates over kv tiles.

    Block shapes:
      q_ref/k_ref/v_ref : (G, tq/tk, D)
      mask_ref          : (1, 1, tq, tk) [shared] or (1, G, tq, tk) [per_head]
      o_ref             : (1, tq, G*D)   (lane-dense slab)
      q_sc              : (G, tq, D)     scaled q (hoisted out of kv loop)
      m_sc / l_sc       : (G, tq, 128)   running max / denom, lane-broadcast
      acc_sc            : (G, tq, D)     f32 output accumulator
    """
    qi = pl.program_id(1)
    ki = pl.program_id(2)

    @pl.when(ki == 0)
    def _init():
        q_sc[...] = q_ref[...] * scale        # fold 1/sqrt(D) into q, once
        m_sc[...] = jnp.full_like(m_sc, DEFAULT_MASK_VALUE)
        l_sc[...] = jnp.zeros_like(l_sc)
        acc_sc[...] = jnp.zeros_like(acc_sc)

    def _update():
        if mask_mode == "shared":
            keep_shared = mask_ref[0, 0] != 0          # (tq, tk), hoisted over heads
        for g in range(G):                              # static, small (<=4)
            q_g = q_sc[g]                               # (tq, D), already scaled
            k_g = k_ref[g]                              # (tk, D)
            v_g = v_ref[g]                              # (tk, D)

            # scores = q @ k^T : contract last dims, no explicit transpose.
            s = lax.dot_general(q_g, k_g, (((1,), (1,)), ((), ())),
                                preferred_element_type=jnp.float32)  # (tq, tk)

            if mask_mode == "causal":
                row = qi * tq + lax.broadcasted_iota(jnp.int32, s.shape, 0)
                col = ki * tk + lax.broadcasted_iota(jnp.int32, s.shape, 1)
                s = jnp.where(row >= col, s, DEFAULT_MASK_VALUE)
            elif mask_mode == "shared":
                s = jnp.where(keep_shared, s, DEFAULT_MASK_VALUE)
            elif mask_mode == "per_head":
                s = jnp.where(mask_ref[0, g] != 0, s, DEFAULT_MASK_VALUE)

            # Online softmax update (stats lane-broadcast across 128 lanes).
            m_prev = m_sc[g]                                        # (tq, 128)
            l_prev = l_sc[g]                                        # (tq, 128)
            m_curr = jnp.max(s, axis=-1, keepdims=True)             # (tq, 1)
            m_next = jnp.maximum(m_prev, m_curr)                    # (tq, 128)

            alpha = jnp.exp(m_prev - m_next)                        # (tq, 128)
            p = jnp.exp(s - m_next[:, :1])                          # (tq, tk) f32

            l_sc[g] = alpha * l_prev + jnp.sum(p, axis=-1, keepdims=True)
            acc_sc[g] = alpha[:, :1] * acc_sc[g] + jnp.dot(
                p.astype(v_g.dtype), v_g, preferred_element_type=jnp.float32)
            m_sc[g] = m_next

    if mask_mode == "causal":
        # Skip kv tiles that lie entirely above the diagonal for this q tile.
        pl.when(ki * tk < (qi + 1) * tq)(_update)
    else:
        _update()

    @pl.when(ki == pl.num_programs(2) - 1)
    def _finalize():
        outs = []
        for g in range(G):
            inv_l = pl.reciprocal(l_sc[g][:, :1], approx=False)     # (tq, 1)
            outs.append((acc_sc[g] * inv_l).astype(o_ref.dtype))    # (tq, D)
        # Lane-dense (tq, G*D) store.
        o_ref[0] = outs[0] if G == 1 else jnp.concatenate(outs, axis=-1)


def _kernel_with_mask(q_ref, k_ref, v_ref, mask_ref, o_ref, q_sc, m_sc, l_sc,
                      acc_sc, **kw):
    _flash_body(q_ref, k_ref, v_ref, mask_ref, o_ref, q_sc, m_sc, l_sc, acc_sc, **kw)


def _kernel_no_mask(q_ref, k_ref, v_ref, o_ref, q_sc, m_sc, l_sc, acc_sc, **kw):
    _flash_body(q_ref, k_ref, v_ref, None, o_ref, q_sc, m_sc, l_sc, acc_sc, **kw)


def _pick_tile(s, target, mult):
    """Largest tile <= target that divides s and is a multiple of `mult`;
    falls back to the full length s (always legal under the (8,128) rule)."""
    if s <= target:
        return s
    t = (target // mult) * mult
    while t >= mult:
        if s % t == 0:
            return t
        t -= mult
    return s


def _pick_head_group(H, D):
    """Heads per grid step so the output slab is lane-dense (G*D -> 128)."""
    if D % 128 == 0:
        return 1
    g = min(H, max(1, 128 // D))
    while g > 1:
        if H % g == 0 and ((g * D) % 128 == 0 or g == H):
            return g
        g -= 1
    return 1


def scaled_dot_product_attention(q, k, v, mask=None, *, causal=False,
                                 q_block=512, kv_block=1024):
    """Pallas TPU implementation of ScaledDotProductAttention.forward.

    mask: optional boolean (or int) array broadcastable to [B, H, S, S],
          True = attend (PyTorch convention).  `causal=True` generates the
          causal mask in-kernel (mask must be None in that case).
    """
    B, H, S, D = q.shape
    assert k.shape == (B, H, S, D) and v.shape == (B, H, S, D)
    if causal:
        assert mask is None, "pass either an explicit mask or causal=True, not both"

    G = _pick_head_group(H, D)          # heads fused into one lane-dense slab
    hpg = H // G                        # head-groups per batch
    BH = B * H
    ng = BH // G                        # grid extent along the head-group axis

    qf = q.reshape(BH, S, D)
    kf = k.reshape(BH, S, D)
    vf = v.reshape(BH, S, D)

    # Tile sizes: big tiles (working set is tiny vs VMEM); tk multiple of 128
    # keeps the (tq, tk) score / prob tiles lane-dense.
    tq = _pick_tile(S, q_block, 8)
    tk = _pick_tile(S, kv_block, 128)
    n_q, n_kv = S // tq, S // tk
    grid = (ng, n_q, n_kv)
    scale = 1.0 / math.sqrt(D)

    q_spec = pl.BlockSpec((G, tq, D), lambda gh, qi, ki: (gh, qi, 0))
    if causal:
        # Clamp the kv block index to the last tile this q tile actually needs:
        # skipped tiles map to an already-resident block -> no DMA for them.
        def kv_index(gh, qi, ki):
            last_needed = ((qi + 1) * tq - 1) // tk
            return (gh, jnp.minimum(ki, last_needed), 0)
        kv_spec = pl.BlockSpec((G, tk, D), kv_index)
    else:
        kv_spec = pl.BlockSpec((G, tk, D), lambda gh, qi, ki: (gh, ki, 0))

    out_spec = pl.BlockSpec((1, tq, G * D), lambda gh, qi, ki: (gh, qi, 0))
    out_shape = jax.ShapeDtypeStruct((ng, S, G * D), q.dtype)

    # Mask handling: keep the compact (Bm, Hm, S, S) layout, never broadcast to
    # (B, H, S, S) in HBM; the index_map does the broadcast.
    mask_mode = "causal" if causal else "none"
    mask_arr = None
    mask_spec = None
    if mask is not None:
        m4 = jnp.asarray(mask)
        if m4.ndim < 4:
            m4 = m4.reshape((1,) * (4 - m4.ndim) + m4.shape)
        assert m4.ndim == 4, "mask must be broadcastable to [B, H, S, S]"
        Bm, Hm = int(m4.shape[0]), int(m4.shape[1])
        assert Bm in (1, B) and Hm in (1, H), "mask not broadcastable to [B,H,S,S]"
        assert m4.shape[2] in (1, S) and m4.shape[3] in (1, S)
        m4 = jnp.broadcast_to(m4, (Bm, Hm, S, S)).astype(jnp.int8)
        if Hm == 1:
            mask_mode = "shared"
            if Bm == 1:
                mask_spec = pl.BlockSpec((1, 1, tq, tk),
                                         lambda gh, qi, ki: (0, 0, qi, ki))
            else:
                mask_spec = pl.BlockSpec((1, 1, tq, tk),
                                         lambda gh, qi, ki: (gh // hpg, 0, qi, ki))
        else:
            mask_mode = "per_head"
            if Bm == 1:
                mask_spec = pl.BlockSpec((1, G, tq, tk),
                                         lambda gh, qi, ki: (0, gh % hpg, qi, ki))
            else:
                mask_spec = pl.BlockSpec((1, G, tq, tk),
                                         lambda gh, qi, ki: (gh // hpg, gh % hpg, qi, ki))
        mask_arr = m4

    scratch = [
        pltpu.VMEM((G, tq, D), q.dtype),        # scaled q (hoisted)
        pltpu.VMEM((G, tq, 128), jnp.float32),  # running row max (lane-broadcast)
        pltpu.VMEM((G, tq, 128), jnp.float32),  # running softmax denom
        pltpu.VMEM((G, tq, D), jnp.float32),    # output accumulator
    ]

    # VMEM budget: double-buffered input/output blocks + scratch; clamp at
    # 48 MiB so v7x (64 MiB physical per-TC) keeps headroom for Mosaic scratch.
    elt = jnp.dtype(q.dtype).itemsize
    blocks = (G * tq * D + 2 * G * tk * D + tq * G * D) * elt
    est = 2 * blocks
    est += G * tq * D * elt + 2 * G * tq * 128 * 4 + G * tq * D * 4
    if mask_arr is not None:
        est += 2 * (G if mask_mode == "per_head" else 1) * tq * tk
    vmem_limit = int(min(max(4 * est, 32 << 20), 48 << 20))

    cparams = pltpu.CompilerParams(
        dimension_semantics=("parallel", "parallel", "arbitrary"),
        vmem_limit_bytes=vmem_limit,
    )

    kwargs = dict(scale=scale, G=G, tq=tq, tk=tk, mask_mode=mask_mode)
    if mask_arr is None:
        kernel = functools.partial(_kernel_no_mask, **kwargs)
        in_specs = [q_spec, kv_spec, kv_spec]
        args = (qf, kf, vf)
    else:
        kernel = functools.partial(_kernel_with_mask, **kwargs)
        in_specs = [q_spec, kv_spec, kv_spec, mask_spec]
        args = (qf, kf, vf, mask_arr)

    out = pl.pallas_call(
        kernel,
        out_shape=out_shape,
        grid_spec=pltpu.PrefetchScalarGridSpec(
            num_scalar_prefetch=0,
            grid=grid,
            in_specs=in_specs,
            out_specs=out_spec,
            scratch_shapes=scratch,
        ),
        compiler_params=cparams,
    )(*args)

    # (B*H//G, S, G*D) -> (B, H, S, D)   (layout plumbing in the wrapper)
    out = out.reshape(B, hpg, S, G, D)
    out = jnp.swapaxes(out, 2, 3)
    return out.reshape(B, H, S, D)


def _reference_sdpa(q, k, v, mask=None):
    """Pure-JAX reference mirroring the PyTorch fallback path."""
    d_key = k.shape[-1]
    scores = jnp.einsum("bhqd,bhkd->bhqk", q, k) / math.sqrt(d_key)
    if mask is not None:
        scores = jnp.where(mask, scores, -jnp.inf)
    attn = jax.nn.softmax(scores, axis=-1)
    return jnp.einsum("bhqk,bhkd->bhqd", attn, v)


if __name__ == "__main__":
    key = jax.random.PRNGKey(0)
    B, H, S, D = 2, 4, 8, 32
    kq, kk, kv_, km = jax.random.split(key, 4)
    q = jax.random.normal(kq, (B, H, S, D), dtype=jnp.float32)
    k = jax.random.normal(kk, (B, H, S, D), dtype=jnp.float32)
    v = jax.random.normal(kv_, (B, H, S, D), dtype=jnp.float32)

    atol = rtol = 2e-3

    # 1) Shared (S, S) causal boolean mask (compact, not broadcast per head).
    causal_2d = jnp.tril(jnp.ones((S, S), dtype=jnp.bool_))
    out1 = jax.block_until_ready(scaled_dot_product_attention(q, k, v, causal_2d))
    ref1 = _reference_sdpa(q, k, v, causal_2d)
    assert jnp.allclose(out1, ref1, atol=atol, rtol=rtol), (
        float(jnp.max(jnp.abs(out1 - ref1))))

    # 2) No mask.
    out2 = jax.block_until_ready(scaled_dot_product_attention(q, k, v, None))
    ref2 = _reference_sdpa(q, k, v, None)
    assert jnp.allclose(out2, ref2, atol=atol, rtol=rtol), (
        float(jnp.max(jnp.abs(out2 - ref2))))

    # 3) In-kernel causal mask (no mask DMA, kv-tile skipping).
    out3 = jax.block_until_ready(
        scaled_dot_product_attention(q, k, v, None, causal=True))
    assert jnp.allclose(out3, ref1, atol=atol, rtol=rtol), (
        float(jnp.max(jnp.abs(out3 - ref1))))

    # 4) Per-head [B, H, S, S] mask (diagonal forced True so no empty rows).
    rand = jax.random.bernoulli(km, 0.6, (B, H, S, S))
    mask4 = jnp.logical_or(rand, jnp.eye(S, dtype=jnp.bool_))
    out4 = jax.block_until_ready(scaled_dot_product_attention(q, k, v, mask4))
    ref4 = _reference_sdpa(q, k, v, mask4)
    assert jnp.allclose(out4, ref4, atol=atol, rtol=rtol), (
        float(jnp.max(jnp.abs(out4 - ref4))))

    print("KERNEL_OK")
</pallas_src>

<mosaic_0001>
module attributes {stable_mosaic.version = 11 : i64} {
  func.func @_kernel_with_mask(%arg0: i32, %arg1: i32, %arg2: i32, %arg3: memref<4x8x32xf32, #tpu.memory_space<vmem>>, %arg4: memref<4x8x32xf32, #tpu.memory_space<vmem>>, %arg5: memref<4x8x32xf32, #tpu.memory_space<vmem>>, %arg6: memref<1x1x8x8xi8, #tpu.memory_space<vmem>>, %arg7: memref<1x8x128xf32, #tpu.memory_space<vmem>>, %arg8: memref<4x8x32xf32, #tpu.memory_space<vmem>>, %arg9: memref<4x8x128xf32, #tpu.memory_space<vmem>>, %arg10: memref<4x8x128xf32, #tpu.memory_space<vmem>>, %arg11: memref<4x8x32xf32, #tpu.memory_space<vmem>>) attributes {dimension_semantics = [#tpu.dimension_semantics<parallel>, #tpu.dimension_semantics<parallel>, #tpu.dimension_semantics<arbitrary>], iteration_bounds = array<i64: 2, 1, 1>, scalar_prefetch = 0 : i64, scratch_operands = 4 : i64, tpu.core_type = #tpu.core_type<tc>, window_params = [{transform_indices = @transform_0, window_bounds = array<i64: 4, 8, 32>}, {transform_indices = @transform_1, window_bounds = array<i64: 4, 8, 32>}, {transform_indices = @transform_2, window_bounds = array<i64: 4, 8, 32>}, {transform_indices = @transform_3, window_bounds = array<i64: 1, 1, 8, 8>}, {transform_indices = @transform_4, window_bounds = array<i64: 1, 8, 128>}]} {
    %c0_i32 = arith.constant 0 : i32
    %0 = arith.cmpi eq, %arg2, %c0_i32 : i32
    %1 = arith.extui %0 : i1 to i32
    %c0_i32_0 = arith.constant 0 : i32
    %2 = arith.cmpi ne, %1, %c0_i32_0 : i32
    scf.if %2 {
      %c0_130 = arith.constant 0 : index
      %c0_131 = arith.constant 0 : index
      %c0_132 = arith.constant 0 : index
      %186 = vector.load %arg3[%c0_130, %c0_131, %c0_132] : memref<4x8x32xf32, #tpu.memory_space<vmem>>, vector<4x8x32xf32>
      %cst_133 = arith.constant 0.176776692 : f32
      %187 = vector.broadcast %cst_133 : f32 to vector<4x8x32xf32>
      %188 = arith.mulf %186, %187 : vector<4x8x32xf32>
      %c0_134 = arith.constant 0 : index
      %c0_135 = arith.constant 0 : index
      %c0_136 = arith.constant 0 : index
      %189 = vector.load %arg8[%c0_134, %c0_135, %c0_136] : memref<4x8x32xf32, #tpu.memory_space<vmem>>, vector<4x8x32xf32>
      tpu.vector_store %arg8[%c0_134, %c0_135, %c0_136], %188 {strides = array<i32>} : memref<4x8x32xf32, #tpu.memory_space<vmem>>, vector<4x8x32xf32>,
      %cst_137 = arith.constant -2.38197633E+38 : f32
      %190 = vector.broadcast %cst_137 : f32 to vector<4x8x128xf32>
      %c0_138 = arith.constant 0 : index
      %c0_139 = arith.constant 0 : index
      %c0_140 = arith.constant 0 : index
      %191 = vector.load %arg9[%c0_138, %c0_139, %c0_140] : memref<4x8x128xf32, #tpu.memory_space<vmem>>, vector<4x8x128xf32>
      tpu.vector_store %arg9[%c0_138, %c0_139, %c0_140], %190 {strides = array<i32>} : memref<4x8x128xf32, #tpu.memory_space<vmem>>, vector<4x8x128xf32>,
      %cst_141 = arith.constant 0.000000e+00 : f32
      %192 = vector.broadcast %cst_141 : f32 to vector<4x8x128xf32>
      %c0_142 = arith.constant 0 : index
      %c0_143 = arith.constant 0 : index
      %c0_144 = arith.constant 0 : index
      %193 = vector.load %arg10[%c0_142, %c0_143, %c0_144] : memref<4x8x128xf32, #tpu.memory_space<vmem>>, vector<4x8x128xf32>
      tpu.vector_store %arg10[%c0_142, %c0_143, %c0_144], %192 {strides = array<i32>} : memref<4x8x128xf32, #tpu.memory_space<vmem>>, vector<4x8x128xf32>,
      %cst_145 = arith.constant 0.000000e+00 : f32
      %194 = vector.broadcast %cst_145 : f32 to vector<4x8x32xf32>
      %c0_146 = arith.constant 0 : index
      %c0_147 = arith.constant 0 : index
      %c0_148 = arith.constant 0 : index
      %195 = vector.load %arg11[%c0_146, %c0_147, %c0_148] : memref<4x8x32xf32, #tpu.memory_space<vmem>>, vector<4x8x32xf32>
      tpu.vector_store %arg11[%c0_146, %c0_147, %c0_148], %194 {strides = array<i32>} : memref<4x8x32xf32, #tpu.memory_space<vmem>>, vector<4x8x32xf32>,
    } else {
    }
    %c0 = arith.constant 0 : index
    %c0_1 = arith.constant 0 : index
    %c0_2 = arith.constant 0 : index
    %c0_3 = arith.constant 0 : index
    %3 = vector.load %arg6[%c0, %c0_1, %c0_2, %c0_3] : memref<1x1x8x8xi8, #tpu.memory_space<vmem>>, vector<1x1x8x8xi8>
    %4 = vector.shape_cast %3 : vector<1x1x8x8xi8> to vector<8x8xi8>
    %c0_i8 = arith.constant 0 : i8
    %5 = vector.broadcast %c0_i8 : i8 to vector<8x8xi8>
    %6 = arith.cmpi ne, %4, %5 : vector<8x8xi8>
    %c0_4 = arith.constant 0 : index
    %c0_5 = arith.constant 0 : index
    %c0_6 = arith.constant 0 : index
    %7 = vector.load %arg8[%c0_4, %c0_5, %c0_6] : memref<4x8x32xf32, #tpu.memory_space<vmem>>, vector<1x8x32xf32>
    %8 = vector.shape_cast %7 : vector<1x8x32xf32> to vector<8x32xf32>
    %c0_7 = arith.constant 0 : index
    %c0_8 = arith.constant 0 : index
    %c0_9 = arith.constant 0 : index
    %9 = vector.load %arg4[%c0_7, %c0_8, %c0_9] : memref<4x8x32xf32, #tpu.memory_space<vmem>>, vector<1x8x32xf32>
    %10 = vector.shape_cast %9 : vector<1x8x32xf32> to vector<8x32xf32>
    %c0_10 = arith.constant 0 : index
    %c0_11 = arith.constant 0 : index
    %c0_12 = arith.constant 0 : index
    %11 = vector.load %arg5[%c0_10, %c0_11, %c0_12] : memref<4x8x32xf32, #tpu.memory_space<vmem>>, vector<1x8x32xf32>
    %12 = vector.shape_cast %11 : vector<1x8x32xf32> to vector<8x32xf32>
    %cst = arith.constant dense<0.000000e+00> : vector<8x8xf32>
    %13 = tpu.matmul %8, %10, %cst {dimension_numbers = #tpu.dot_dimension_numbers<[1], [1], [0], [0], [0, 0, 1, 0], [], []>} : vector<8x32xf32>, vector<8x32xf32>, vector<8x8xf32> -> vector<8x8xf32>
    %cst_13 = arith.constant -2.38197633E+38 : f32
    %14 = vector.broadcast %cst_13 : f32 to vector<8x8xf32>
    %15 = arith.select %6, %13, %14 : vector<8x8xi1>, vector<8x8xf32>
    %c0_14 = arith.constant 0 : index
    %c0_15 = arith.constant 0 : index
    %c0_16 = arith.constant 0 : index
    %16 = vector.load %arg9[%c0_14, %c0_15, %c0_16] : memref<4x8x128xf32, #tpu.memory_space<vmem>>, vector<1x8x128xf32>
    %17 = vector.shape_cast %16 : vector<1x8x128xf32> to vector<8x128xf32>
    %c0_17 = arith.constant 0 : index
    %c0_18 = arith.constant 0 : index
    %c0_19 = arith.constant 0 : index
    %18 = vector.load %arg10[%c0_17, %c0_18, %c0_19] : memref<4x8x128xf32, #tpu.memory_space<vmem>>, vector<1x8x128xf32>
    %19 = vector.shape_cast %18 : vector<1x8x128xf32> to vector<8x128xf32>
    %cst_20 = arith.constant dense<0xFF800000> : vector<8xf32>
    %20 = vector.multi_reduction <maximumf>, %15, %cst_20 [1] : vector<8x8xf32> to vector<8xf32>
    %21 = vector.shape_cast %20 : vector<8xf32> to vector<8x1xf32>
    %22 = vector.broadcast %21 : vector<8x1xf32> to vector<8x128xf32>
    %23 = arith.maximumf %17, %22 : vector<8x128xf32>
    %24 = arith.subf %17, %23 : vector<8x128xf32>
    %25 = math.exp %24 : vector<8x128xf32>
    %26 = vector.extract_strided_slice %23 {offsets = [0, 0], sizes = [8, 1], strides = [1, 1]} : vector<8x128xf32> to vector<8x1xf32>
    %27 = vector.broadcast %26 : vector<8x1xf32> to vector<8x8xf32>
    %28 = arith.subf %15, %27 : vector<8x8xf32>
    %29 = math.exp %28 : vector<8x8xf32>
    %30 = arith.mulf %25, %19 : vector<8x128xf32>
    %cst_21 = arith.constant dense<0.000000e+00> : vector<8xf32>
    %31 = vector.multi_reduction <add>, %29, %cst_21 [1] : vector<8x8xf32> to vector<8xf32>
    %32 = vector.shape_cast %31 : vector<8xf32> to vector<8x1xf32>
    %33 = vector.broadcast %32 : vector<8x1xf32> to vector<8x128xf32>
    %34 = arith.addf %30, %33 : vector<8x128xf32>
    %c0_22 = arith.constant 0 : index
    %c0_23 = arith.constant 0 : index
    %c0_24 = arith.constant 0 : index
    %35 = vector.load %arg10[%c0_22, %c0_23, %c0_24] : memref<4x8x128xf32, #tpu.memory_space<vmem>>, vector<1x8x128xf32>
    %36 = vector.shape_cast %35 : vector<1x8x128xf32> to vector<8x128xf32>
    %37 = vector.shape_cast %34 : vector<8x128xf32> to vector<1x8x128xf32>
    tpu.vector_store %arg10[%c0_22, %c0_23, %c0_24], %37 {strides = array<i32>} : memref<4x8x128xf32, #tpu.memory_space<vmem>>, vector<1x8x128xf32>,
    %38 = vector.extract_strided_slice %25 {offsets = [0, 0], sizes = [8, 1], strides = [1, 1]} : vector<8x128xf32> to vector<8x1xf32>
    %c0_25 = arith.constant 0 : index
    %c0_26 = arith.constant 0 : index
    %c0_27 = arith.constant 0 : index
    %39 = vector.load %arg11[%c0_25, %c0_26, %c0_27] : memref<4x8x32xf32, #tpu.memory_space<vmem>>, vector<1x8x32xf32>
    %40 = vector.shape_cast %39 : vector<1x8x32xf32> to vector<8x32xf32>
    %41 = vector.broadcast %38 : vector<8x1xf32> to vector<8x32xf32>
    %42 = arith.mulf %41, %40 : vector<8x32xf32>
    %cst_28 = arith.constant dense<0.000000e+00> : vector<8x32xf32>
    %43 = tpu.matmul %29, %12, %cst_28 {dimension_numbers = #tpu.dot_dimension_numbers<[1], [0], [0], [1], [0, 0, 1, 1], [], []>} : vector<8x8xf32>, vector<8x32xf32>, vector<8x32xf32> -> vector<8x32xf32>
    %44 = arith.addf %42, %43 : vector<8x32xf32>
    %c0_29 = arith.constant 0 : index
    %c0_30 = arith.constant 0 : index
    %c0_31 = arith.constant 0 : index
    %45 = vector.load %arg11[%c0_29, %c0_30, %c0_31] : memref<4x8x32xf32, #tpu.memory_space<vmem>>, vector<1x8x32xf32>
    %46 = vector.shape_cast %45 : vector<1x8x32xf32> to vector<8x32xf32>
    %47 = vector.shape_cast %44 : vector<8x32xf32> to vector<1x8x32xf32>
    tpu.vector_store %arg11[%c0_29, %c0_30, %c0_31], %47 {strides = array<i32>} : memref<4x8x32xf32, #tpu.memory_space<vmem>>, vector<1x8x32xf32>,
    %c0_32 = arith.constant 0 : index
    %c0_33 = arith.constant 0 : index
    %c0_34 = arith.constant 0 : index
    %48 = vector.load %arg9[%c0_32, %c0_33, %c0_34] : memref<4x8x128xf32, #tpu.memory_space<vmem>>, vector<1x8x128xf32>
    %49 = vector.shape_cast %48 : vector<1x8x128xf32> to vector<8x128xf32>
    %50 = vector.shape_cast %23 : vector<8x128xf32> to vector<1x8x128xf32>
    tpu.vector_store %arg9[%c0_32, %c0_33, %c0_34], %50 {strides = array<i32>} : memref<4x8x128xf32, #tpu.memory_space<vmem>>, vector<1x8x128xf32>,
    %c1 = arith.constant 1 : index
    %c0_35 = arith.constant 0 : index
    %c0_36 = arith.constant 0 : index
    %51 = vector.load %arg8[%c1, %c0_35, %c0_36] : memref<4x8x32xf32, #tpu.memory_space<vmem>>, vector<1x8x32xf32>
    %52 = vector.shape_cast %51 : vector<1x8x32xf32> to vector<8x32xf32>
    %c1_37 = arith.constant 1 : index
    %c0_38 = arith.constant 0 : index
    %c0_39 = arith.constant 0 : index
    %53 = vector.load %arg4[%c1_37, %c0_38, %c0_39] : memref<4x8x32xf32, #tpu.memory_space<vmem>>, vector<1x8x32xf32>
    %54 = vector.shape_cast %53 : vector<1x8x32xf32> to vector<8x32xf32>
    %c1_40 = arith.constant 1 : index
    %c0_41 = arith.constant 0 : index
    %c0_42 = arith.constant 0 : index
    %55 = vector.load %arg5[%c1_40, %c0_41, %c0_42] : memref<4x8x32xf32, #tpu.memory_space<vmem>>, vector<1x8x32xf32>
    %56 = vector.shape_cast %55 : vector<1x8x32xf32> to vector<8x32xf32>
    %cst_43 = arith.constant dense<0.000000e+00> : vector<8x8xf32>
    %57 = tpu.matmul %52, %54, %cst_43 {dimension_numbers = #tpu.dot_dimension_numbers<[1], [1], [0], [0], [0, 0, 1, 0], [], []>} : vector<8x32xf32>, vector<8x32xf32>, vector<8x8xf32> -> vector<8x8xf32>
    %cst_44 = arith.constant -2.38197633E+38 : f32
    %58 = vector.broadcast %cst_44 : f32 to vector<8x8xf32>
    %59 = arith.select %6, %57, %58 : vector<8x8xi1>, vector<8x8xf32>
    %c1_45 = arith.constant 1 : index
    %c0_46 = arith.constant 0 : index
    %c0_47 = arith.constant 0 : index
    %60 = vector.load %arg9[%c1_45, %c0_46, %c0_47] : memref<4x8x128xf32, #tpu.memory_space<vmem>>, vector<1x8x128xf32>
    %61 = vector.shape_cast %60 : vector<1x8x128xf32> to vector<8x128xf32>
    %c1_48 = arith.constant 1 : index
    %c0_49 = arith.constant 0 : index
    %c0_50 = arith.constant 0 : index
    %62 = vector.load %arg10[%c1_48, %c0_49, %c0_50] : memref<4x8x128xf32, #tpu.memory_space<vmem>>, vector<1x8x128xf32>
    %63 = vector.shape_cast %62 : vector<1x8x128xf32> to vector<8x128xf32>
    %cst_51 = arith.constant dense<0xFF800000> : vector<8xf32>
    %64 = vector.multi_reduction <maximumf>, %59, %cst_51 [1] : vector<8x8xf32> to vector<8xf32>
    %65 = vector.shape_cast %64 : vector<8xf32> to vector<8x1xf32>
    %66 = vector.broadcast %65 : vector<8x1xf32> to vector<8x128xf32>
    %67 = arith.maximumf %61, %66 : vector<8x128xf32>
    %68 = arith.subf %61, %67 : vector<8x128xf32>
    %69 = math.exp %68 : vector<8x128xf32>
    %70 = vector.extract_strided_slice %67 {offsets = [0, 0], sizes = [8, 1], strides = [1, 1]} : vector<8x128xf32> to vector<8x1xf32>
    %71 = vector.broadcast %70 : vector<8x1xf32> to vector<8x8xf32>
    %72 = arith.subf %59, %71 : vector<8x8xf32>
    %73 = math.exp %72 : vector<8x8xf32>
    %74 = arith.mulf %69, %63 : vector<8x128xf32>
    %cst_52 = arith.constant dense<0.000000e+00> : vector<8xf32>
    %75 = vector.multi_reduction <add>, %73, %cst_52 [1] : vector<8x8xf32> to vector<8xf32>
    %76 = vector.shape_cast %75 : vector<8xf32> to vector<8x1xf32>
    %77 = vector.broadcast %76 : vector<8x1xf32> to vector<8x128xf32>
    %78 = arith.addf %74, %77 : vector<8x128xf32>
    %c1_53 = arith.constant 1 : index
    %c0_54 = arith.constant 0 : index
    %c0_55 = arith.constant 0 : index
    %79 = vector.load %arg10[%c1_53, %c0_54, %c0_55] : memref<4x8x128xf32, #tpu.memory_space<vmem>>, vector<1x8x128xf32>
    %80 = vector.shape_cast %79 : vector<1x8x128xf32> to vector<8x128xf32>
    %81 = vector.shape_cast %78 : vector<8x128xf32> to vector<1x8x128xf32>
    tpu.vector_store %arg10[%c1_53, %c0_54, %c0_55], %81 {strides = array<i32>} : memref<4x8x128xf32, #tpu.memory_space<vmem>>, vector<1x8x128xf32>,
    %82 = vector.extract_strided_slice %69 {offsets = [0, 0], sizes = [8, 1], strides = [1, 1]} : vector<8x128xf32> to vector<8x1xf32>
    %c1_56 = arith.constant 1 : index
    %c0_57 = arith.constant 0 : index
    %c0_58 = arith.constant 0 : index
    %83 = vector.load %arg11[%c1_56, %c0_57, %c0_58] : memref<4x8x32xf32, #tpu.memory_space<vmem>>, vector<1x8x32xf32>
    %84 = vector.shape_cast %83 : vector<1x8x32xf32> to vector<8x32xf32>
    %85 = vector.broadcast %82 : vector<8x1xf32> to vector<8x32xf32>
    %86 = arith.mulf %85, %84 : vector<8x32xf32>
    %cst_59 = arith.constant dense<0.000000e+00> : vector<8x32xf32>
    %87 = tpu.matmul %73, %56, %cst_59 {dimension_numbers = #tpu.dot_dimension_numbers<[1], [0], [0], [1], [0, 0, 1, 1], [], []>} : vector<8x8xf32>, vector<8x32xf32>, vector<8x32xf32> -> vector<8x32xf32>
    %88 = arith.addf %86, %87 : vector<8x32xf32>
    %c1_60 = arith.constant 1 : index
    %c0_61 = arith.constant 0 : index
    %c0_62 = arith.constant 0 : index
    %89 = vector.load %arg11[%c1_60, %c0_61, %c0_62] : memref<4x8x32xf32, #tpu.memory_space<vmem>>, vector<1x8x32xf32>
    %90 = vector.shape_cast %89 : vector<1x8x32xf32> to vector<8x32xf32>
    %91 = vector.shape_cast %88 : vector<8x32xf32> to vector<1x8x32xf32>
    tpu.vector_store %arg11[%c1_60, %c0_61, %c0_62], %91 {strides = array<i32>} : memref<4x8x32xf32, #tpu.memory_space<vmem>>, vector<1x8x32xf32>,
    %c1_63 = arith.constant 1 : index
    %c0_64 = arith.constant 0 : index
    %c0_65 = arith.constant 0 : index
    %92 = vector.load %arg9[%c1_63, %c0_64, %c0_65] : memref<4x8x128xf32, #tpu.memory_space<vmem>>, vector<1x8x128xf32>
    %93 = vector.shape_cast %92 : vector<1x8x128xf32> to vector<8x128xf32>
    %94 = vector.shape_cast %67 : vector<8x128xf32> to vector<1x8x128xf32>
    tpu.vector_store %arg9[%c1_63, %c0_64, %c0_65], %94 {strides = array<i32>} : memref<4x8x128xf32, #tpu.memory_space<vmem>>, vector<1x8x128xf32>,
    %c2 = arith.constant 2 : index
    %c0_66 = arith.constant 0 : index
    %c0_67 = arith.constant 0 : index
    %95 = vector.load %arg8[%c2, %c0_66, %c0_67] : memref<4x8x32xf32, #tpu.memory_space<vmem>>, vector<1x8x32xf32>
    %96 = vector.shape_cast %95 : vector<1x8x32xf32> to vector<8x32xf32>
    %c2_68 = arith.constant 2 : index
    %c0_69 = arith.constant 0 : index
    %c0_70 = arith.constant 0 : index
    %97 = vector.load %arg4[%c2_68, %c0_69, %c0_70] : memref<4x8x32xf32, #tpu.memory_space<vmem>>, vector<1x8x32xf32>
    %98 = vector.shape_cast %97 : vector<1x8x32xf32> to vector<8x32xf32>
    %c2_71 = arith.constant 2 : index
    %c0_72 = arith.constant 0 : index
    %c0_73 = arith.constant 0 : index
    %99 = vector.load %arg5[%c2_71, %c0_72, %c0_73] : memref<4x8x32xf32, #tpu.memory_space<vmem>>, vector<1x8x32xf32>
    %100 = vector.shape_cast %99 : vector<1x8x32xf32> to vector<8x32xf32>
    %cst_74 = arith.constant dense<0.000000e+00> : vector<8x8xf32>
    %101 = tpu.matmul %96, %98, %cst_74 {dimension_numbers = #tpu.dot_dimension_numbers<[1], [1], [0], [0], [0, 0, 1, 0], [], []>} : vector<8x32xf32>, vector<8x32xf32>, vector<8x8xf32> -> vector<8x8xf32>
    %cst_75 = arith.constant -2.38197633E+38 : f32
    %102 = vector.broadcast %cst_75 : f32 to vector<8x8xf32>
    %103 = arith.select %6, %101, %102 : vector<8x8xi1>, vector<8x8xf32>
    %c2_76 = arith.constant 2 : index
    %c0_77 = arith.constant 0 : index
    %c0_78 = arith.constant 0 : index
    %104 = vector.load %arg9[%c2_76, %c0_77, %c0_78] : memref<4x8x128xf32, #tpu.memory_space<vmem>>, vector<1x8x128xf32>
    %105 = vector.shape_cast %104 : vector<1x8x128xf32> to vector<8x128xf32>
    %c2_79 = arith.constant 2 : index
    %c0_80 = arith.constant 0 : index
    %c0_81 = arith.constant 0 : index
    %106 = vector.load %arg10[%c2_79, %c0_80, %c0_81] : memref<4x8x128xf32, #tpu.memory_space<vmem>>, vector<1x8x128xf32>
    %107 = vector.shape_cast %106 : vector<1x8x128xf32> to vector<8x128xf32>
    %cst_82 = arith.constant dense<0xFF800000> : vector<8xf32>
    %108 = vector.multi_reduction <maximumf>, %103, %cst_82 [1] : vector<8x8xf32> to vector<8xf32>
    %109 = vector.shape_cast %108 : vector<8xf32> to vector<8x1xf32>
    %110 = vector.broadcast %109 : vector<8x1xf32> to vector<8x128xf32>
    %111 = arith.maximumf %105, %110 : vector<8x128xf32>
    %112 = arith.subf %105, %111 : vector<8x128xf32>
    %113 = math.exp %112 : vector<8x128xf32>
    %114 = vector.extract_strided_slice %111 {offsets = [0, 0], sizes = [8, 1], strides = [1, 1]} : vector<8x128xf32> to vector<8x1xf32>
    %115 = vector.broadcast %114 : vector<8x1xf32> to vector<8x8xf32>
    %116 = arith.subf %103, %115 : vector<8x8xf32>
    %117 = math.exp %116 : vector<8x8xf32>
    %118 = arith.mulf %113, %107 : vector<8x128xf32>
    %cst_83 = arith.constant dense<0.000000e+00> : vector<8xf32>
    %119 = vector.multi_reduction <add>, %117, %cst_83 [1] : vector<8x8xf32> to vector<8xf32>
    %120 = vector.shape_cast %119 : vector<8xf32> to vector<8x1xf32>
    %121 = vector.broadcast %120 : vector<8x1xf32> to vector<8x128xf32>
    %122 = arith.addf %118, %121 : vector<8x128xf32>
    %c2_84 = arith.constant 2 : index
    %c0_85 = arith.constant 0 : index
    %c0_86 = arith.constant 0 : index
    %123 = vector.load %arg10[%c2_84, %c0_85, %c0_86] : memref<4x8x128xf32, #tpu.memory_space<vmem>>, vector<1x8x128xf32>
    %124 = vector.shape_cast %123 : vector<1x8x128xf32> to vector<8x128xf32>
    %125 = vector.shape_cast %122 : vector<8x128xf32> to vector<1x8x128xf32>
    tpu.vector_store %arg10[%c2_84, %c0_85, %c0_86], %125 {strides = array<i32>} : memref<4x8x128xf32, #tpu.memory_space<vmem>>, vector<1x8x128xf32>,
    %126 = vector.extract_strided_slice %113 {offsets = [0, 0], sizes = [8, 1], strides = [1, 1]} : vector<8x128xf32> to vector<8x1xf32>
    %c2_87 = arith.constant 2 : index
    %c0_88 = arith.constant 0 : index
    %c0_89 = arith.constant 0 : index
    %127 = vector.load %arg11[%c2_87, %c0_88, %c0_89] : memref<4x8x32xf32, #tpu.memory_space<vmem>>, vector<1x8x32xf32>
    %128 = vector.shape_cast %127 : vector<1x8x32xf32> to vector<8x32xf32>
    %129 = vector.broadcast %126 : vector<8x1xf32> to vector<8x32xf32>
    %130 = arith.mulf %129, %128 : vector<8x32xf32>
    %cst_90 = arith.constant dense<0.000000e+00> : vector<8x32xf32>
    %131 = tpu.matmul %117, %100, %cst_90 {dimension_numbers = #tpu.dot_dimension_numbers<[1], [0], [0], [1], [0, 0, 1, 1], [], []>} : vector<8x8xf32>, vector<8x32xf32>, vector<8x32xf32> -> vector<8x32xf32>
    %132 = arith.addf %130, %131 : vector<8x32xf32>
    %c2_91 = arith.constant 2 : index
    %c0_92 = arith.constant 0 : index
    %c0_93 = arith.constant 0 : index
    %133 = vector.load %arg11[%c2_91, %c0_92, %c0_93] : memref<4x8x32xf32, #tpu.memory_space<vmem>>, vector<1x8x32xf32>
    %134 = vector.shape_cast %133 : vector<1x8x32xf32> to vector<8x32xf32>
    %135 = vector.shape_cast %132 : vector<8x32xf32> to vector<1x8x32xf32>
    tpu.vector_store %arg11[%c2_91, %c0_92, %c0_93], %135 {strides = array<i32>} : memref<4x8x32xf32, #tpu.memory_space<vmem>>, vector<1x8x32xf32>,
    %c2_94 = arith.constant 2 : index
    %c0_95 = arith.constant 0 : index
    %c0_96 = arith.constant 0 : index
    %136 = vector.load %arg9[%c2_94, %c0_95, %c0_96] : memref<4x8x128xf32, #tpu.memory_space<vmem>>, vector<1x8x128xf32>
    %137 = vector.shape_cast %136 : vector<1x8x128xf32> to vector<8x128xf32>
    %138 = vector.shape_cast %111 : vector<8x128xf32> to vector<1x8x128xf32>
    tpu.vector_store %arg9[%c2_94, %c0_95, %c0_96], %138 {strides = array<i32>} : memref<4x8x128xf32, #tpu.memory_space<vmem>>, vector<1x8x128xf32>,
    %c3 = arith.constant 3 : index
    %c0_97 = arith.constant 0 : index
    %c0_98 = arith.constant 0 : index
    %139 = vector.load %arg8[%c3, %c0_97, %c0_98] : memref<4x8x32xf32, #tpu.memory_space<vmem>>, vector<1x8x32xf32>
    %140 = vector.shape_cast %139 : vector<1x8x32xf32> to vector<8x32xf32>
    %c3_99 = arith.constant 3 : index
    %c0_100 = arith.constant 0 : index
    %c0_101 = arith.constant 0 : index
    %141 = vector.load %arg4[%c3_99, %c0_100, %c0_101] : memref<4x8x32xf32, #tpu.memory_space<vmem>>, vector<1x8x32xf32>
    %142 = vector.shape_cast %141 : vector<1x8x32xf32> to vector<8x32xf32>
    %c3_102 = arith.constant 3 : index
    %c0_103 = arith.constant 0 : index
    %c0_104 = arith.constant 0 : index
    %143 = vector.load %arg5[%c3_102, %c0_103, %c0_104] : memref<4x8x32xf32, #tpu.memory_space<vmem>>, vector<1x8x32xf32>
    %144 = vector.shape_cast %143 : vector<1x8x32xf32> to vector<8x32xf32>
    %cst_105 = arith.constant dense<0.000000e+00> : vector<8x8xf32>
    %145 = tpu.matmul %140, %142, %cst_105 {dimension_numbers = #tpu.dot_dimension_numbers<[1], [1], [0], [0], [0, 0, 1, 0], [], []>} : vector<8x32xf32>, vector<8x32xf32>, vector<8x8xf32> -> vector<8x8xf32>
    %cst_106 = arith.constant -2.38197633E+38 : f32
    %146 = vector.broadcast %cst_106 : f32 to vector<8x8xf32>
    %147 = arith.select %6, %145, %146 : vector<8x8xi1>, vector<8x8xf32>
    %c3_107 = arith.constant 3 : index
    %c0_108 = arith.constant 0 : index
    %c0_109 = arith.constant 0 : index
    %148 = vector.load %arg9[%c3_107, %c0_108, %c0_109] : memref<4x8x128xf32, #tpu.memory_space<vmem>>, vector<1x8x128xf32>
    %149 = vector.shape_cast %148 : vector<1x8x128xf32> to vector<8x128xf32>
    %c3_110 = arith.constant 3 : index
    %c0_111 = arith.constant 0 : index
    %c0_112 = arith.constant 0 : index
    %150 = vector.load %arg10[%c3_110, %c0_111, %c0_112] : memref<4x8x128xf32, #tpu.memory_space<vmem>>, vector<1x8x128xf32>
    %151 = vector.shape_cast %150 : vector<1x8x128xf32> to vector<8x128xf32>
    %cst_113 = arith.constant dense<0xFF800000> : vector<8xf32>
    %152 = vector.multi_reduction <maximumf>, %147, %cst_113 [1] : vector<8x8xf32> to vector<8xf32>
    %153 = vector.shape_cast %152 : vector<8xf32> to vector<8x1xf32>
    %154 = vector.broadcast %153 : vector<8x1xf32> to vector<8x128xf32>
    %155 = arith.maximumf %149, %154 : vector<8x128xf32>
    %156 = arith.subf %149, %155 : vector<8x128xf32>
    %157 = math.exp %156 : vector<8x128xf32>
    %158 = vector.extract_strided_slice %155 {offsets = [0, 0], sizes = [8, 1], strides = [1, 1]} : vector<8x128xf32> to vector<8x1xf32>
    %159 = vector.broadcast %158 : vector<8x1xf32> to vector<8x8xf32>
    %160 = arith.subf %147, %159 : vector<8x8xf32>
    %161 = math.exp %160 : vector<8x8xf32>
    %162 = arith.mulf %157, %151 : vector<8x128xf32>
    %cst_114 = arith.constant dense<0.000000e+00> : vector<8xf32>
    %163 = vector.multi_reduction <add>, %161, %cst_114 [1] : vector<8x8xf32> to vector<8xf32>
    %164 = vector.shape_cast %163 : vector<8xf32> to vector<8x1xf32>
    %165 = vector.broadcast %164 : vector<8x1xf32> to vector<8x128xf32>
    %166 = arith.addf %162, %165 : vector<8x128xf32>
    %c3_115 = arith.constant 3 : index
    %c0_116 = arith.constant 0 : index
    %c0_117 = arith.constant 0 : index
    %167 = vector.load %arg10[%c3_115, %c0_116, %c0_117] : memref<4x8x128xf32, #tpu.memory_space<vmem>>, vector<1x8x128xf32>
    %168 = vector.shape_cast %167 : vector<1x8x128xf32> to vector<8x128xf32>
    %169 = vector.shape_cast %166 : vector<8x128xf32> to vector<1x8x128xf32>
    tpu.vector_store %arg10[%c3_115, %c0_116, %c0_117], %169 {strides = array<i32>} : memref<4x8x128xf32, #tpu.memory_space<vmem>>, vector<1x8x128xf32>,
    %170 = vector.extract_strided_slice %157 {offsets = [0, 0], sizes = [8, 1], strides = [1, 1]} : vector<8x128xf32> to vector<8x1xf32>
    %c3_118 = arith.constant 3 : index
    %c0_119 = arith.constant 0 : index
    %c0_120 = arith.constant 0 : index
    %171 = vector.load %arg11[%c3_118, %c0_119, %c0_120] : memref<4x8x32xf32, #tpu.memory_space<vmem>>, vector<1x8x32xf32>
    %172 = vector.shape_cast %171 : vector<1x8x32xf32> to vector<8x32xf32>
    %173 = vector.broadcast %170 : vector<8x1xf32> to vector<8x32xf32>
    %174 = arith.mulf %173, %172 : vector<8x32xf32>
    %cst_121 = arith.constant dense<0.000000e+00> : vector<8x32xf32>
    %175 = tpu.matmul %161, %144, %cst_121 {dimension_numbers = #tpu.dot_dimension_numbers<[1], [0], [0], [1], [0, 0, 1, 1], [], []>} : vector<8x8xf32>, vector<8x32xf32>, vector<8x32xf32> -> vector<8x32xf32>
    %176 = arith.addf %174, %175 : vector<8x32xf32>
    %c3_122 = arith.constant 3 : index
    %c0_123 = arith.constant 0 : index
    %c0_124 = arith.constant 0 : index
    %177 = vector.load %arg11[%c3_122, %c0_123, %c0_124] : memref<4x8x32xf32, #tpu.memory_space<vmem>>, vector<1x8x32xf32>
    %178 = vector.shape_cast %177 : vector<1x8x32xf32> to vector<8x32xf32>
    %179 = vector.shape_cast %176 : vector<8x32xf32> to vector<1x8x32xf32>
    tpu.vector_store %arg11[%c3_122, %c0_123, %c0_124], %179 {strides = array<i32>} : memref<4x8x32xf32, #tpu.memory_space<vmem>>, vector<1x8x32xf32>,
    %c3_125 = arith.constant 3 : index
    %c0_126 = arith.constant 0 : index
    %c0_127 = arith.constant 0 : index
    %180 = vector.load %arg9[%c3_125, %c0_126, %c0_127] : memref<4x8x128xf32, #tpu.memory_space<vmem>>, vector<1x8x128xf32>
    %181 = vector.shape_cast %180 : vector<1x8x128xf32> to vector<8x128xf32>
    %182 = vector.shape_cast %155 : vector<8x128xf32> to vector<1x8x128xf32>
    tpu.vector_store %arg9[%c3_125, %c0_126, %c0_127], %182 {strides = array<i32>} : memref<4x8x128xf32, #tpu.memory_space<vmem>>, vector<1x8x128xf32>,
    %c0_i32_128 = arith.constant 0 : i32
    %183 = arith.cmpi eq, %arg2, %c0_i32_128 : i32
    %184 = arith.extui %183 : i1 to i32
    %c0_i32_129 = arith.constant 0 : i32
    %185 = arith.cmpi ne, %184, %c0_i32_129 : i32
    scf.if %185 {
      %c0_130 = arith.constant 0 : index
      %c0_131 = arith.constant 0 : index
      %c0_132 = arith.constant 0 : index
      %186 = vector.load %arg10[%c0_130, %c0_131, %c0_132] : memref<4x8x128xf32, #tpu.memory_space<vmem>>, vector<1x8x128xf32>
      %187 = vector.shape_cast %186 : vector<1x8x128xf32> to vector<8x128xf32>
      %188 = vector.extract_strided_slice %187 {offsets = [0, 0], sizes = [8, 1], strides = [1, 1]} : vector<8x128xf32> to vector<8x1xf32>
      %189 = tpu.reciprocal %188 : vector<8x1xf32> -> vector<8x1xf32>
      %c0_133 = arith.constant 0 : index
      %c0_134 = arith.constant 0 : index
      %c0_135 = arith.constant 0 : index
      %190 = vector.load %arg11[%c0_133, %c0_134, %c0_135] : memref<4x8x32xf32, #tpu.memory_space<vmem>>, vector<1x8x32xf32>
      %191 = vector.shape_cast %190 : vector<1x8x32xf32> to vector<8x32xf32>
      %192 = vector.broadcast %189 : vector<8x1xf32> to vector<8x32xf32>
      %193 = arith.mulf %191, %192 : vector<8x32xf32>
      %c1_136 = arith.constant 1 : index
      %c0_137 = arith.constant 0 : index
      %c0_138 = arith.constant 0 : index
      %194 = vector.load %arg10[%c1_136, %c0_137, %c0_138] : memref<4x8x128xf32, #tpu.memory_space<vmem>>, vector<1x8x128xf32>
      %195 = vector.shape_cast %194 : vector<1x8x128xf32> to vector<8x128xf32>
      %196 = vector.extract_strided_slice %195 {offsets = [0, 0], sizes = [8, 1], strides = [1, 1]} : vector<8x128xf32> to vector<8x1xf32>
      %197 = tpu.reciprocal %196 : vector<8x1xf32> -> vector<8x1xf32>
      %c1_139 = arith.constant 1 : index
      %c0_140 = arith.constant 0 : index
      %c0_141 = arith.constant 0 : index
      %198 = vector.load %arg11[%c1_139, %c0_140, %c0_141] : memref<4x8x32xf32, #tpu.memory_space<vmem>>, vector<1x8x32xf32>
      %199 = vector.shape_cast %198 : vector<1x8x32xf32> to vector<8x32xf32>
      %200 = vector.broadcast %197 : vector<8x1xf32> to vector<8x32xf32>
      %201 = arith.mulf %199, %200 : vector<8x32xf32>
      %c2_142 = arith.constant 2 : index
      %c0_143 = arith.constant 0 : index
      %c0_144 = arith.constant 0 : index
      %202 = vector.load %arg10[%c2_142, %c0_143, %c0_144] : memref<4x8x128xf32, #tpu.memory_space<vmem>>, vector<1x8x128xf32>
      %203 = vector.shape_cast %202 : vector<1x8x128xf32> to vector<8x128xf32>
      %204 = vector.extract_strided_slice %203 {offsets = [0, 0], sizes = [8, 1], strides = [1, 1]} : vector<8x128xf32> to vector<8x1xf32>
      %205 = tpu.reciprocal %204 : vector<8x1xf32> -> vector<8x1xf32>
      %c2_145 = arith.constant 2 : index
      %c0_146 = arith.constant 0 : index
      %c0_147 = arith.constant 0 : index
      %206 = vector.load %arg11[%c2_145, %c0_146, %c0_147] : memref<4x8x32xf32, #tpu.memory_space<vmem>>, vector<1x8x32xf32>
      %207 = vector.shape_cast %206 : vector<1x8x32xf32> to vector<8x32xf32>
      %208 = vector.broadcast %205 : vector<8x1xf32> to vector<8x32xf32>
      %209 = arith.mulf %207, %208 : vector<8x32xf32>
      %c3_148 = arith.constant 3 : index
      %c0_149 = arith.constant 0 : index
      %c0_150 = arith.constant 0 : index
      %210 = vector.load %arg10[%c3_148, %c0_149, %c0_150] : memref<4x8x128xf32, #tpu.memory_space<vmem>>, vector<1x8x128xf32>
      %211 = vector.shape_cast %210 : vector<1x8x128xf32> to vector<8x128xf32>
      %212 = vector.extract_strided_slice %211 {offsets = [0, 0], sizes = [8, 1], strides = [1, 1]} : vector<8x128xf32> to vector<8x1xf32>
      %213 = tpu.reciprocal %212 : vector<8x1xf32> -> vector<8x1xf32>
      %c3_151 = arith.constant 3 : index
      %c0_152 = arith.constant 0 : index
      %c0_153 = arith.constant 0 : index
      %214 = vector.load %arg11[%c3_151, %c0_152, %c0_153] : memref<4x8x32xf32, #tpu.memory_space<vmem>>, vector<1x8x32xf32>
      %215 = vector.shape_cast %214 : vector<1x8x32xf32> to vector<8x32xf32>
      %216 = vector.broadcast %213 : vector<8x1xf32> to vector<8x32xf32>
      %217 = arith.mulf %215, %216 : vector<8x32xf32>
      %218 = tpu.concatenate %193, %201, %209, %217 in 1 : vector<8x32xf32>, vector<8x32xf32>, vector<8x32xf32>, vector<8x32xf32> -> vector<8x128xf32>
      %c0_154 = arith.constant 0 : index
      %c0_155 = arith.constant 0 : index
      %c0_156 = arith.constant 0 : index
      %219 = vector.load %arg7[%c0_154, %c0_155, %c0_156] : memref<1x8x128xf32, #tpu.memory_space<vmem>>, vector<1x8x128xf32>
      %220 = vector.shape_cast %219 : vector<1x8x128xf32> to vector<8x128xf32>
      %221 = vector.shape_cast %218 : vector<8x128xf32> to vector<1x8x128xf32>
      tpu.vector_store %arg7[%c0_154, %c0_155, %c0_156], %221 {strides = array<i32>} : memref<1x8x128xf32, #tpu.memory_space<vmem>>, vector<1x8x128xf32>,
    } else {
    }
    return
  }
  func.func @transform_0(%arg0: i32, %arg1: i32, %arg2: i32) -> (i32, i32, i32) {
    %c0_i32 = arith.constant 0 : i32
    %c0_i32_0 = arith.constant 0 : i32
    return %arg0, %arg1, %c0_i32 : i32, i32, i32
  }
  func.func @transform_1(%arg0: i32, %arg1: i32, %arg2: i32) -> (i32, i32, i32) {
    %c0_i32 = arith.constant 0 : i32
    %c0_i32_0 = arith.constant 0 : i32
    return %arg0, %arg2, %c0_i32 : i32, i32, i32
  }
  func.func @transform_2(%arg0: i32, %arg1: i32, %arg2: i32) -> (i32, i32, i32) {
    %c0_i32 = arith.constant 0 : i32
    %c0_i32_0 = arith.constant 0 : i32
    return %arg0, %arg2, %c0_i32 : i32, i32, i32
  }
  func.func @transform_3(%arg0: i32, %arg1: i32, %arg2: i32) -> (i32, i32, i32, i32) {
    %c0_i32 = arith.constant 0 : i32
    %c0_i32_0 = arith.constant 0 : i32
    %c0_i32_1 = arith.constant 0 : i32
    return %c0_i32, %c0_i32_0, %arg1, %arg2 : i32, i32, i32, i32
  }
  func.func @transform_4(%arg0: i32, %arg1: i32, %arg2: i32) -> (i32, i32, i32) {
    %c0_i32 = arith.constant 0 : i32
    %c0_i32_0 = arith.constant 0 : i32
    return %arg0, %arg1, %c0_i32 : i32, i32, i32
  }
}

</mosaic_0001>

<bundles_post_ra>
// kernel: tpu_custom_call.1
= control target key start
LH: loop header
LB: loop body
LE: loop exit
PB: predicated region body
PF: predicated region fallthrough
CT: control target
= control target key end

     0   :  { %s1649_s0 = inlined_call_operand.hbm [shape: f32[8,8,32], index: 0, kind: input, shape index: {}]   ;;  %s1650_s1 = inlined_call_operand.hbm [shape: f32[8,8,32], index: 1, kind: input, shape index: {}]   ;;  %s1651_s2 = inlined_call_operand.hbm [shape: f32[8,8,32], index: 2, kind: input, shape index: {}]   ;;  %s1652_s3 = inlined_call_operand.vmem [shape: s8[1,1,8,8], index: 3, kind: input, shape index: {}]   ;;  %s1653_s4 = inlined_call_operand.hbm [shape: f32[2,8,128], index: 4, kind: output, shape index: {}]  }
   0x1   :  { %1660 = sst [smem:[#allocation22_spill]] %s1650_s1 }
   0x2   :  { %9 = vsyncpa [#allocation7], 0 }
   0x3   :  { %11 = vsyncpa [#allocation7 + $0x1], 0 }
   0x4   :  { %12 = vsyncpa [#allocation10], 0 }
   0x5   :  { %14 = vsyncpa [#allocation10 + $0x1], 0 }
   0x6   :  { %15 = vsyncpa [#allocation8], 0 }
   0x7   :  { %17 = vsyncpa [#allocation8 + $0x1], 0  ;;  %s1395_s15 = smov 0   ;;  %s1397_s16 = smov 0  }
   0x8   :  { %s1399_s17 = smov 0   ;;  %s1401_s18 = smov 0  }
   0x9   :  { %s1403_s19 = smov 0   ;;  %s1405_s20 = smov 0  }
   0xa LB: > { %1661 = sst [smem:[#allocation16_spill]] %s1349_s17  ;;  %s1426_s21 = sadd.s32 4294967295, %s1361_s20   ;;  %s1361_s20 = sphi %s1405_s20, %s23_s20   ;;  %s1357_s19 = sphi %s1403_s19, %s1681_s19   ;;  %s1353_s18 = sphi %s1401_s18, %s1680_s18   ;;  %s1349_s17 = sphi %s1399_s17, %s1679_s17   ;;  %s1345_s16 = sphi %s1397_s16, %s1683_s16   ;;  %s1341_s15 = sphi %s1395_s15, %s1682_s15  }
   0xb   : > { %1662 = sst [smem:[#allocation17_spill]] %s1357_s19  ;;  %s1036_s22 = sadd.s32 4294967294, %s1361_s20  }
   0xc   : > { %1663 = sst [smem:[#allocation18_spill]] %s1361_s20  ;;  %s42_s23 = sadd.s32 1, %s1357_s19 }
   0xd   : > { %s51_s24 = sadd.s32 1, %s1349_s17  ;;  %p44_p0 = scmp.ge.s32.totalorder %s42_s23, 2 }
   0xe   : > { %p58_p1 = scmp.ne.s32.totalorder %s1349_s17, %s1345_s16  ;;  %p59_p2 = scmp.eq.s32.totalorder %s1361_s20, 0 }
   0xf   : > { %p64_p3 = scmp.ne.s32.totalorder %s1345_s16, %s1341_s15  ;;  %s1685_s23 = smov (%p44_p0, %s42_s23), 0 }
  0x10   : > { %1664 = sst [smem:[#allocation19_spill]] %s1685_s23  ;;  %p1438_p4 = por %p59_p2, %p58_p1 }
  0x11   : > { %p65_p5 = scmp.eq.s32.totalorder %s1426_s21, 0  ;;  %s46_s26 = ssub.s32 %s1357_s19, %s1685_s23 }
  0x12   : > { %p174_p6 = scmp.eq.s32.totalorder %s1426_s21, 1  ;;  %p49_p7 = scmp.eq.s32.totalorder %s46_s26, 0 }
  0x13   : > { %p1446_p8 = por %p65_p5, %p64_p3  ;;  %p180_p10 = scmp.eq.s32.totalorder %s1036_s22, 1 }
  0x14   : > { %p1450_p9 = por %p174_p6, %p58_p1  ;;  %p1039_p12 = scmp.ge.s32.totalorder %s1361_s20, 2 }
  0x15   : > { %s1455_s29 = scalar_select %p49_p7, %s1349_s17, %s51_s24  }
  0x16   : > { %p1457_p11 = por %p180_p10, %p64_p3  ;;  %p1101_p13 = scmp.lt.s32.totalorder %s1361_s20, 2 }
  0x17   : > { %1668 = sst [smem:[#allocation20_spill]] %s1455_s29  ;;  %s210_s5 = sand.u32 1, %s1349_s17  }
  0x18   : > { %s1669_s30 = scalar_select %p1457_p11, 1, 0 }
  0x19   : > { %s1464_s6 = sshll.u32 %s210_s5, 5  ;;  %s1076_s7 = sshll.u32 %s1357_s19, 5 }
  0x1a   : > { %1670 = sst [smem:[#allocation21_spill]] %s1669_s30  ;;  %p1469_p0 = pnand %p1101_p13, %p1438_p4 }
  0x1b   : > { %s233_s9 = sand.u32 1, %s1361_s20   ;;  %s1672_s1 = sld [smem:[#allocation22_spill]] }
  0x1c   : > { %s237_s14 = scalar_lea.vmem [#allocation9], %s1464_s6  ;;  %s234_s24 = scalar_lea.sflag [#allocation10], %s233_s9 }
  0x1d   : > { %s246_s22 = sshll.u32 %s237_s14, 4  ;;  %s1363_s26 = smov 128   ;;  %s247_s22 = int_to_ptr.vmem [resolvable:$true] %s246_s22 }
  0x1e   : > { %s1364_s25 = smov 8   ;;  %p1049_p1 = scmp.ge.s32.totalorder %s1361_s20, 1 }
  0x1f   : > { %p277_p2 = scmp.lt.s32.totalorder %s1361_s20, 3  ;;  %s211_s9 = scalar_lea.sflag [#allocation7], %s210_s5 }
  0x20   : > { %s266_s29 = scalar_lea.hbm %s1651_s2, %s1076_s7  ;;  %s260_s20 = scalar_lea.vmem [#allocation11], %s1464_s6 }
  0x21   : > { %s243_s12 = scalar_lea.hbm %s1672_s1, %s1076_s7  ;;  %p1482_p3 = pnand %p1049_p1, %p277_p2 }
  0x22   : > { %s244_s13 = sshll.u32 %s243_s12, 4  ;;  %s220_s12 = scalar_lea.hbm %s1649_s0, %s1076_s7  ;;  %s245_s13 = int_to_ptr.hbm [resolvable:$true] %s244_s13 }
  0x23   : > { %1093 = dma.hbm_to_vmem [thread:$0]  (!%p1469_p0), %s245_s13, 512, %s247_s22, %s234_s24, %s1363_s26, %s1363_s26, %s1364_s25  }
  0x24   : > { %s221_s14 = sshll.u32 %s220_s12, 4  ;;  %s214_s1 = scalar_lea.vmem [#allocation6], %s1464_s6  ;;  %s222_s14 = int_to_ptr.hbm [resolvable:$true] %s221_s14 }
  0x25   : > { %s223_s19 = sshll.u32 %s214_s1, 4  ;;  %s267_s17 = sshll.u32 %s266_s29, 4  ;;  %s224_s19 = int_to_ptr.vmem [resolvable:$true] %s223_s19  ;;  %s268_s17 = int_to_ptr.hbm [resolvable:$true] %s267_s17 }
  0x26   : > { %1090 = dma.hbm_to_vmem [thread:$0]  (!%p1469_p0), %s222_s14, 512, %s224_s19, %s211_s9, %s1363_s26, %s1363_s26, %s1364_s25  }
  0x27   : > { %s269_s30 = sshll.u32 %s260_s20, 4  ;;  %281 = sbr.rel (%p1482_p3) target bundleno = 1185 (0x4a1), region = 36  ;;  %s270_s30 = int_to_ptr.vmem [resolvable:$true] %s269_s30 }
  0x28   : > { %1096 = dma.hbm_to_vmem [thread:$0]  (!%p1469_p0), %s268_s17, 512, %s270_s30, %s234_s24, %s1363_s26, %s1363_s26, %s1364_s25  }
  0x29   : > { %s1501_s1 = sand.u32 (!%p1482_p3), 1, %s1345_s16  }
  0x2a   : > { %s1504_s19 = sshll.u32 (!%p1482_p3), %s1501_s1, 5  ;;  %s284_s5 = scalar_lea.sflag (!%p1482_p3), [#allocation7], %s1501_s1 }
  0x2b   : > { %s1508_s29 = scalar_lea.vmem (!%p1482_p3), [#allocation6], %s1504_s19 }
  0x2c   : > { %1328 = dma.done.wait (%p1446_p8), %s284_s5, 512  }
  0x2d   : > { %1330 = vsyncadd (%p1446_p8), %s284_s5, 4294966784  ;;  %s293_s17 = sand.u32 1, %s1426_s21   ;;  %s1516_s23 = scalar_lea.vmem [#allocation9], %s1504_s19 }
  0x2e   : > { %s294_s20 = scalar_lea.sflag [#allocation10], %s293_s17 }
  0x2f   : > { %1332 = dma.done.wait (%p1446_p8), %s294_s20, 1024  }
  0x30   : > { %1334 = vsyncadd (%p1446_p8), %s294_s20, 4294966272  ;;  %vm374_vm0 = vcmask 261120   ;;  %v394_v0 = vld [vmem:[%s1516_s23] sm:$0xff]  ;;  %v1057_v2 = vld [vmem:[%s1516_s23 + $0x8] sm:$0xff]  ;;  %v1365_v12 = vmov 0   ;;  %vm429_vm3 = vcmask 64512  }
  0x31   : > { %v366_v1 = vld [vmem:[%s1508_s29] sm:$0xff]  ;;  %1054 = vmatpush.xpose.msk.msra.mxu0 %vm374_vm0, %v394_v0  ;;  %1059 = vmatpush.xpose.msk.msra.mxu2 %vm374_vm0, %v1057_v2  ;;  %v367_v4 = vld [vmem:[%s1508_s29 + $0x8] sm:$0xff]  ;;  %v1067_v5 = vld [vmem:[%s1516_s23 + $0x18] sm:$0xff]  ;;  %s1564_s30 = scalar_lea.vmem [#allocation11], %s1504_s19  ;;  %s1367_s6 = smov 32  }
  0x32   : > { %v370_v3 = vmul.f32 0.17677669, %v366_v1  ;;  %v369_v6 = vld [vmem:[%s1508_s29 + $0x18] sm:$0xff]  ;;  %v371_v7 = vmul.f32 0.17677669, %v367_v4  ;;  %1158 = vset.pattern.permute.xlu0 %v1365_v12  ;;  %1159 = vset.pattern.permute.xlu2 %v1365_v12  ;;  %v395_v32 = vld [vmem:[%s1564_s30] sm:$0xff] }
  0x33   : > { %v373_v8 = vmul.f32 0.17677669, %v369_v6  ;;  %1160 = vset.pattern.permute.xlu1 %v1365_v12  ;;  %v391_v13 = vld [vmem:[%s1652_s3] sm:$0x3]  ;;  %476 = vmatpush.msra.mxu1 %v395_v32  ;;  %v368_v33 = vld [vmem:[%s1508_s29 + $0x10] sm:$0xff]  ;;  %v1058_v54 = vld [vmem:[%s1564_s30 + $0x8] sm:$0xff] }
  0x34   : > { %375 = vst.msk [vmem:[#allocation2] sm:$0xff] %vm374_vm0, %v370_v3  ;;  %vm392_vm1 = vnez %v391_v13  ;;  %v372_v34 = vmul.f32 0.17677669, %v368_v33  ;;  %v1062_v35 = vld [vmem:[%s1516_s23 + $0x10] sm:$0xff]  ;;  %v1068_v58 = vld [vmem:[%s1564_s30 + $0x18] sm:$0xff]  ;;  %568 = vmatpush.msra.mxu3 %v1058_v54  ;;  %s1368_s7 = smov 96  }
  0x35   : > { %1069 = vmatpush.xpose.msk.msrb.mxu0 %vm374_vm0, %v1067_v5  ;;  %376 = vst.msk [vmem:[#allocation2 + $0x8] sm:$0xff] %vm374_vm0, %v371_v7  ;;  %v423_v14 = vsel %vm392_vm1, 16843009, %v1365_v12  ;;  %1064 = vmatpush.xpose.msk.msrb.mxu1 %vm374_vm0, %v1062_v35  ;;  %s1369_s8 = smov 64   ;;  %s1053_s24 = sshll.u32 %s1501_s1, 3 }
  0x36   : > { %378 = vst.msk [vmem:[#allocation2 + $0x18] sm:$0xff] %vm374_vm0, %v373_v8  ;;  %v424_v15 = vunpack.c.0.s8 %v423_v14  ;;  %752 = vmatpush.msrb.mxu2 %v1068_v58  ;;  %s1073_s26 = sshll.u32 %s1353_s18, 3  ;;  %s349_s12 = scalar_lea.vmem [#allocation12], %s1053_s24 }
  0x37   : > { %377 = vst.msk [vmem:[#allocation2 + $0x10] sm:$0xff] %vm374_vm0, %v372_v34  ;;  %s881_s11 = scalar_lea.hbm %s1653_s4, %s1073_s26  ;;  %s883_s14 = sshll.u32 %s349_s12, 4  ;;  %s884_s14 = int_to_ptr.vmem [resolvable:$true] %s883_s14 }
  0x38   : > { %vm1540_vm2 = vcmp.ne.s32.totalorder %v424_v15, 0  ;;  %v1366_v15 = vmov 0.0   ;;  %s885_s9 = sshll.u32 %s881_s11, 4  ;;  %s870_s18 = scalar_lea.sflag [#allocation8], %s1501_s1  ;;  %s886_s9 = int_to_ptr.hbm [resolvable:$true] %s885_s9 }
  0x39   : > { %388 = vst.msk [vmem:[#allocation5 + $0x8] sm:$0xff] %vm374_vm0, %v1366_v15  ;;  %s1289_s13 = sshra.s32 %s886_s9, 4  ;;  %s1295_s29 = scalar_lea.hbm %s1653_s4, 16  ;;  %s1290_s13 = int_to_ptr.hbm [resolvable:$true] %s1289_s13 }
  0x3a   : > { %387 = vst.msk [vmem:[#allocation5] sm:$0xff] %vm374_vm0, %v1366_v15  ;;  %s1291_s22 = scalar_lea.hbm %s1290_s13, 8  ;;  %p1296_p7 = scmp.lt.s32.totalorder %s1290_s13, %s1653_s4 }
  0x3b   : > { %v393_v9 = vld [vmem:[#allocation2] sm:$0xff]  ;;  %389 = vst.msk [vmem:[#allocation5 + $0x10] sm:$0xff] %vm374_vm0, %v1366_v15  ;;  %p1292_p4 = scmp.ne.s32.totalorder %s1290_s13, %s1291_s22  ;;  %p1297_p8 = scmp.lt.s32.totalorder %s1295_s29, %s1291_s22 }
  0x3c   : > { %1055 = vmatmul.msk.f32.vlgmr.msra.gmra.mxu0 %vm374_vm0, %v393_v9  ;;  %v485_v10 = vld [vmem:[#allocation2 + $0x8] sm:$0xff]  ;;  %390 = vst.msk [vmem:[#allocation5 + $0x18] sm:$0xff] %vm374_vm0, %v1366_v15 }
  0x3d   : > { %1060 = vmatmul.msk.f32.vlgmr.msra.gmra.mxu2 %vm374_vm0, %v485_v10  ;;  %v669_v11 = vld [vmem:[#allocation2 + $0x18] sm:$0xff]  ;;  %p1293_p5 = pnand %p1292_p4, %p1450_p9  ;;  %p1298_p10 = por %p1297_p8, %p1296_p7 }
  0x3e   : > { %v577_v46 = vld [vmem:[#allocation2 + $0x10] sm:$0xff] }
  0x3f   : > { %p1294_p6 = pneg %p1293_p5 }
  0x41   : > { %p1299_p13 = pnand %p1298_p10, %p1294_p6 }
  0x44   : > { %1070 = vmatmul.msk.f32.vlgmr.msrb.gmra.mxu0 %vm374_vm0, %v669_v11 }
  0xb9   : > { %v420_v17 = vpop.f32.mrf.mxu0 }
  0xba   : > { %v426_v18 = vsel %vm1540_vm2, %v420_v17, -2.3819763e+38 }
  0xbb   : > { %v430_v19 = vsel %vm429_vm3, %v426_v18, -inf }
  0xbc   : > { %431 = vmax.xlane.f32.xlu0 %v430_v19  ;;  %v543_v19 = vld [vmem:[#allocation5 + $0x8] sm:$0xff] }
  0xc0   : > { %v513_v20 = vpop.f32.mrf.mxu2 }
  0xc1   : > { %v516_v21 = vsel %vm1540_vm2, %v513_v20, -2.3819763e+38  ;;  %v697_v22 = vpop.f32.mrf.mxu0 }
  0xc2   : > { %v521_v23 = vsel %vm429_vm3, %v516_v21, -inf  ;;  %v700_v24 = vsel %vm1540_vm2, %v697_v22, -2.3819763e+38 }
  0xc3   : > { %522 = vmax.xlane.f32.xlu1 %v521_v23  ;;  %v705_v25 = vsel %vm429_vm3, %v700_v24, -inf }
  0xc4   : > { %706 = vmax.xlane.f32.xlu2 %v705_v25 }
 0x12f   : > { %v1553_v26 = vpop.xlane.xlu0 %431 }
 0x130   : > { %v433_v27 = vmax.f32 %v1553_v26, -2.3819763e+38 }
 0x132   : > { %439 = vperm.xlu0 %1158, %v433_v27   ;;  %v434_v11 = vsub.f32 -2.3819763e+38, %v433_v27 }
 0x134   : > { %v435_v12 = vmul.f32 1.442695, %v434_v11 }
 0x136   : > { %v523_v28 = vpop.xlane.xlu1 %522 }
 0x137   : > { %v524_v29 = vmax.f32 %v523_v28, -2.3819763e+38  ;;  %v1558_v30 = vpop.xlane.xlu2 %706 }
 0x138   : > { %v708_v31 = vmax.f32 %v1558_v30, -2.3819763e+38 }
 0x139   : > { %530 = vperm.xlu2 %1159, %v524_v29   ;;  %v525_v47 = vsub.f32 -2.3819763e+38, %v524_v29 }
 0x13a   : > { %v709_v13 = vsub.f32 -2.3819763e+38, %v708_v31 }
 0x13b   : > { %v526_v50 = vmul.f32 1.442695, %v525_v47 }
 0x13c   : > { %v710_v16 = vmul.f32 1.442695, %v709_v13 }
 0x141   : > { %714 = vperm.xlu2 %1159, %v708_v31  }
 0x193   : > { %v531_v36 = vpop.permute.xlu2 %530 }
 0x194   : > { %v533_v37 = vsub.f32 %v516_v21, %v531_v36 }
 0x196   : > { %v534_v38 = vmul.f32 1.442695, %v533_v37 }
 0x198   : > { %1161 = vpow2.f32 %v534_v38 }
 0x19b   : > { %v715_v48 = vpop.permute.xlu2 %714 }
 0x19c   : > { %v717_v49 = vsub.f32 %v700_v24, %v715_v48 }
 0x19e   : > { %v1162_v39 = vpop.eup %1161  ;;  %v718_v51 = vmul.f32 1.442695, %v717_v49 }
 0x19f   : > { %v537_v41 = vsel %vm429_vm3, %v1162_v39, 0.0  ;;  %1061 = vmatmul.msk.f32.vlgmr.msra.gmra.mxu3 %vm429_vm3, %v1162_v39 }
 0x1a0   : > { %538 = vadd.xlane.f32.xlu0 %v537_v41 }
 0x1a4   : > { %v440_v40 = vpop.permute.xlu0 %439 }
 0x1a5   : > { %v442_v42 = vsub.f32 %v426_v18, %v440_v40 }
 0x1a7   : > { %v443_v43 = vmul.f32 1.442695, %v442_v42 }
 0x1a9   : > { %1163 = vpow2.f32 %v443_v43 }
 0x1aa   : > { %1165 = vpow2.f32 %v526_v50 }
 0x1ab   : > { %1167 = vpow2.f32 %v718_v51 }
 0x1af   : > { %v1164_v44 = vpop.eup %1163 }
 0x1b0   : > { %1056 = vmatmul.msk.f32.vlgmr.msra.gmra.mxu1 %vm429_vm3, %v1164_v44  ;;  %v446_v45 = vsel %vm429_vm3, %v1164_v44, 0.0  ;;  %v1166_v52 = vpop.eup %1165 }
 0x1b1   : > { %447 = vadd.xlane.f32.xlu2 %v446_v45  ;;  %v1168_v53 = vpop.eup %1167  ;;  %v536_v56 = vmul.f32 0.0, %v1166_v52 }
 0x1b2   : > { %v721_v55 = vsel %vm429_vm3, %v1168_v53, 0.0  ;;  %1071 = vmatmul.msk.f32.vlgmr.msrb.gmra.mxu2 %vm429_vm3, %v1168_v53 }
 0x1b8   : > { %1065 = vmatmul.msk.f32.vlgmr.msrb.gmra.mxu1 %vm374_vm0, %v577_v46 }
 0x1b9   : > { %722 = vadd.xlane.f32.xlu2 %v721_v55 }
 0x1d1   : > { %546 = vperm.xlu2 %1159, %v1166_v52  }
 0x213   : > { %v539_v57 = vpop.xlane.xlu0 %538 }
 0x214   : > { %v540_v59 = vadd.f32 %v539_v57, %v536_v56  ;;  %v1063_v56 = vld [vmem:[%s1564_s30 + $0x10] sm:$0xff] }
 0x215   : > { %660 = vmatpush.msrb.mxu3 %v1063_v56 }
 0x216   : > { %1169 = vrcp.f32 %v540_v59  ;;  %vm791_vm4 = vweird.f32 %v540_v59  ;;  %v797_v1 = vand.u32 2147483648, %v540_v59  ;;  %v795_v3 = vand.u32 2147483647, %v540_v59 }
 0x217   : > { %1171 = vpow2.f32 %v435_v12 }
 0x218   : > { %v798_v4 = vor.u32 1.1754944e-38, %v797_v1  ;;  %vm796_vm7 = vcmp.eq.f32.partialorder %v795_v3, 8.507059e+37  ;;  %1173 = vpow2.f32 %v710_v16 }
 0x21c   : > { %v1170_v60 = vpop.eup %1169 }
 0x21d   : > { %v787_v61 = vmul.f32 %v1170_v60, %v540_v59  ;;  %vm792_vm5 = vweird.f32 %v1170_v60  ;;  %v1596_v18 = vpop.eup %1171 }
 0x21e   : > { %vm793_vm6 = vmor %vm791_vm4, %vm792_vm5  ;;  %v445_v22 = vmul.f32 0.0, %v1596_v18  ;;  %v1174_v24 = vpop.eup %1173  ;;  %vm864_vm5 = vcmask 523264  }
 0x21f   : > { %v788_v62 = vsub.f32 1.0, %v787_v61  ;;  %v720_v26 = vmul.f32 0.0, %v1174_v24 }
 0x221   : > { %v789_v63 = vmul.f32 %v1170_v60, %v788_v62 }
 0x222   : > { %v570_v21 = vpop.f32.mrf.mxu3 }
 0x223   : > { %v790_v2 = vadd.f32 %v1170_v60, %v789_v63 }
 0x224   : > { %v448_v10 = vpop.xlane.xlu2 %447 }
 0x225   : > { %v794_v5 = vsel %vm793_vm6, %v1170_v60, %v790_v2  ;;  %v449_v25 = vadd.f32 %v448_v10, %v445_v22  ;;  %vm866_vm6 = vcmask 785408  }
 0x226   : > { %v799_v8 = vsel %vm796_vm7, %v798_v4, %v794_v5  ;;  %v635_v4 = vld [vmem:[#allocation5 + $0x10] sm:$0xff] }
 0x227   : > { %803 = vperm.xlu2 %1159, %v799_v8   ;;  %1175 = vrcp.f32 %v449_v25  ;;  %v775_v44 = vand.u32 2147483648, %v449_v25  ;;  %vm769_vm9 = vweird.f32 %v449_v25  ;;  %v773_v45 = vand.u32 2147483647, %v449_v25 }
 0x229   : > { %v776_v48 = vor.u32 1.1754944e-38, %v775_v44  ;;  %vm774_vm13 = vcmp.eq.f32.partialorder %v773_v45, 8.507059e+37 }
 0x22c   : > { %v723_v14 = vpop.xlane.xlu2 %722 }
 0x22d   : > { %v1580_v0 = vpop.f32.mrf.mxu1  ;;  %v724_v28 = vadd.f32 %v723_v14, %v720_v26  ;;  %v1176_v31 = vpop.eup %1175 }
 0x22e   : > { %v765_v34 = vmul.f32 %v1176_v31, %v449_v25  ;;  %vm770_vm8 = vweird.f32 %v1176_v31 }
 0x22f   : > { %1177 = vrcp.f32 %v724_v28  ;;  %vm771_vm10 = vmor %vm769_vm9, %vm770_vm8  ;;  %vm835_vm11 = vweird.f32 %v724_v28  ;;  %v841_v49 = vand.u32 2147483648, %v724_v28  ;;  %v839_v51 = vand.u32 2147483647, %v724_v28 }
 0x230   : > { %v766_v38 = vsub.f32 1.0, %v765_v34 }
 0x231   : > { %v842_v53 = vor.u32 1.1754944e-38, %v841_v49  ;;  %vm840_vm15 = vcmp.eq.f32.partialorder %v839_v51, 8.507059e+37 }
 0x232   : > { %v767_v40 = vmul.f32 %v1176_v31, %v766_v38 }
 0x234   : > { %v547_v17 = vpop.permute.xlu2 %546  ;;  %v768_v43 = vadd.f32 %v1176_v31, %v767_v40 }
 0x235   : > { %v605_v6 = vpop.f32.mrf.mxu1  ;;  %v549_v20 = vmul.f32 %v547_v17, %v543_v19  ;;  %v1178_v36 = vpop.eup %1177  ;;  %v451_v17 = vld [vmem:[#allocation5] sm:$0xff] }
 0x236   : > { %v1584_v7 = vsel %vm1540_vm2, %v605_v6, -2.3819763e+38  ;;  %v831_v39 = vmul.f32 %v1178_v36, %v724_v28  ;;  %v772_v47 = vsel %vm771_vm10, %v1176_v31, %v768_v43  ;;  %vm836_vm12 = vweird.f32 %v1178_v36 }
 0x237   : > { %v613_v9 = vsel %vm429_vm3, %v1584_v7, -inf  ;;  %v573_v23 = vadd.f32 %v570_v21, %v549_v20  ;;  %v777_v52 = vsel %vm774_vm13, %v776_v48, %v772_v47  ;;  %vm837_vm14 = vmor %vm835_vm11, %vm836_vm12  ;;  %v727_v21 = vld [vmem:[#allocation5 + $0x18] sm:$0xff] }
 0x238   : > { %614 = vmax.xlane.f32.xlu1 %v613_v9  ;;  %v832_v41 = vsub.f32 1.0, %v831_v39 }
 0x239   : > { %574 = vst.msk [vmem:[#allocation5 + $0x8] sm:$0xff] %vm374_vm0, %v573_v23 }
 0x23a   : > { %v833_v46 = vmul.f32 %v1178_v36, %v832_v41 }
 0x23c   : > { %v834_v50 = vadd.f32 %v1178_v36, %v833_v46 }
 0x23e   : > { %v838_v54 = vsel %vm837_vm14, %v1178_v36, %v834_v50 }
 0x23f   : > { %v843_v55 = vsel %vm840_vm15, %v842_v53, %v838_v54 }
 0x240   : > { %v800_v29 = vld [vmem:[#allocation5 + $0x8] sm:$0xff] }
 0x281   : > { %v804_v27 = vpop.permute.xlu2 %803 }
 0x282   : > { %v806_v30 = vmul.f32 %v804_v27, %v800_v29 }
 0x284   : > { %852 = vrot.lane.b32.xlu2 %v806_v30, %s1367_s6 }
 0x2ab   : > { %v615_v32 = vpop.xlane.xlu1 %614 }
 0x2ac   : > { %v616_v33 = vmax.f32 %v615_v32, -2.3819763e+38 }
 0x2ae   : > { %v617_v35 = vsub.f32 -2.3819763e+38, %v616_v33  ;;  %622 = vperm.xlu1 %1160, %v616_v33  }
 0x2b0   : > { %v618_v37 = vmul.f32 1.442695, %v617_v35 }
 0x2b2   : > { %1179 = vpow2.f32 %v618_v37 }
 0x2b8   : > { %v1180_v42 = vpop.eup %1179 }
 0x2b9   : > { %638 = vperm.xlu0 %1158, %v1180_v42   ;;  %v628_v62 = vmul.f32 0.0, %v1180_v42 }
 0x2c1   : > { %781 = vperm.xlu0 %1158, %v777_v52  }
 0x2c9   : > { %847 = vperm.xlu0 %1158, %v843_v55  }
 0x2de   : > { %v853_v34 = vpop.permute.xlu2 %852 }
 0x320   : > { %v623_v57 = vpop.permute.xlu1 %622 }
 0x321   : > { %v625_v58 = vsub.f32 %v1584_v7, %v623_v57 }
 0x323   : > { %v626_v59 = vmul.f32 1.442695, %v625_v58 }
 0x325   : > { %1181 = vpow2.f32 %v626_v59 }
 0x32b   : > { %v1182_v60 = vpop.eup %1181  ;;  %v639_v5 = vpop.permute.xlu0 %638 }
 0x32c   : > { %1066 = vmatmul.msk.f32.vlgmr.msrb.gmra.mxu3 %vm429_vm3, %v1182_v60  ;;  %v629_v61 = vsel %vm429_vm3, %v1182_v60, 0.0  ;;  %v641_v8 = vmul.f32 %v639_v5, %v635_v4 }
 0x32d   : > { %630 = vadd.xlane.f32.xlu1 %v629_v61 }
 0x333   : > { %v782_v25 = vpop.permute.xlu0 %781 }
 0x33b   : > { %v848_v27 = vpop.permute.xlu0 %847 }
 0x346   : > { %454 = vperm.xlu1 %1160, %v1596_v18  }
 0x34e   : > { %730 = vperm.xlu1 %1160, %v1174_v24   ;;  %v754_v24 = vpop.f32.mrf.mxu2 }
 0x3a0   : > { %v631_v63 = vpop.xlane.xlu1 %630 }
 0x3a1   : > { %v632_v1 = vadd.f32 %v631_v63, %v628_v62 }
 0x3a3   : > { %1183 = vrcp.f32 %v632_v1  ;;  %v819_v7 = vand.u32 2147483648, %v632_v1  ;;  %v817_v10 = vand.u32 2147483647, %v632_v1  ;;  %vm813_vm2 = vweird.f32 %v632_v1 }
 0x3a5   : > { %v820_v14 = vor.u32 1.1754944e-38, %v819_v7  ;;  %vm818_vm4 = vcmp.eq.f32.partialorder %v817_v10, 8.507059e+37 }
 0x3a9   : > { %v1184_v2 = vpop.eup %1183 }
 0x3aa   : > { %v809_v3 = vmul.f32 %v1184_v2, %v632_v1  ;;  %vm814_vm1 = vweird.f32 %v1184_v2 }
 0x3ab   : > { %vm815_vm3 = vmor %vm813_vm2, %vm814_vm1 }
 0x3ac   : > { %v810_v6 = vsub.f32 1.0, %v809_v3 }
 0x3ae   : > { %v811_v9 = vmul.f32 %v1184_v2, %v810_v6 }
 0x3af   : > { %v662_v11 = vpop.f32.mrf.mxu3 }
 0x3b0   : > { %v665_v12 = vadd.f32 %v662_v11, %v641_v8  ;;  %v812_v13 = vadd.f32 %v1184_v2, %v811_v9 }
 0x3b2   : > { %666 = vst.msk [vmem:[#allocation5 + $0x10] sm:$0xff] %vm374_vm0, %v665_v12  ;;  %v816_v15 = vsel %vm815_vm3, %v1184_v2, %v812_v13 }
 0x3b3   : > { %v821_v16 = vsel %vm818_vm4, %v820_v14, %v816_v15 }
 0x3b4   : > { %825 = vperm.xlu1 %1160, %v821_v16  }
 0x3b8   : > { %v455_v18 = vpop.permute.xlu1 %454 }
 0x3b9   : > { %v457_v19 = vmul.f32 %v455_v18, %v451_v17  ;;  %v822_v30 = vld [vmem:[#allocation5 + $0x10] sm:$0xff] }
 0x3bb   : > { %v481_v20 = vadd.f32 %v1580_v0, %v457_v19 }
 0x3bd   : > { %482 = vst.msk [vmem:[#allocation5] sm:$0xff] %vm374_vm0, %v481_v20 }
 0x3c0   : > { %v731_v22 = vpop.permute.xlu1 %730 }
 0x3c1   : > { %v733_v23 = vmul.f32 %v731_v22, %v727_v21 }
 0x3c3   : > { %v757_v26 = vadd.f32 %v754_v24, %v733_v23 }
 0x3c4   : > { %v778_v32 = vld [vmem:[#allocation5] sm:$0xff] }
 0x3c5   : > { %758 = vst.msk [vmem:[#allocation5 + $0x18] sm:$0xff] %vm374_vm0, %v757_v26  ;;  %v784_v33 = vmul.f32 %v782_v25, %v778_v32 }
 0x3c7   : > { %v863_v36 = vsel %vm374_vm0, %v784_v33, %v853_v34 }
 0x3cc   : > { %v844_v28 = vld [vmem:[#allocation5 + $0x18] sm:$0xff] }
 0x3cd   : > { %v850_v29 = vmul.f32 %v848_v27, %v844_v28 }
 0x3cf   : > { %860 = vrot.lane.b32.xlu0 %v850_v29, %s1368_s7 }
 0x426   : > { %v826_v31 = vpop.permute.xlu1 %825 }
 0x427   : > { %v828_v0 = vmul.f32 %v826_v31, %v822_v30 }
 0x429   : > { %856 = vrot.lane.b32.xlu1 %v828_v0, %s1369_s8 }
 0x441   : > { %v861_v37 = vpop.permute.xlu0 %860 }
 0x49b   : > { %v857_v35 = vpop.permute.xlu1 %856 }
 0x49c   : > { %v865_v38 = vsel %vm864_vm5, %v863_v36, %v857_v35 }
 0x49d   : > { %v867_v39 = vsel %vm866_vm6, %v865_v38, %v861_v37 }
 0x49e   : > { %868 = vst [vmem:[%s349_s12] sm:$0xff] %v867_v39 }
 0x49f   : > { %1302 = shalt.err (!%p1299_p13)
}
 0x4a0   : > { %1085 = dma.vmem_to_hbm [thread:$0]  (%p1450_p9), %s884_s14, 128, %s886_s9, %s870_s18  }
 0x4a1 PF: > { %s1677_s23 = sld [smem:[#allocation18_spill]]  ;;  %s897_s21 = sand.u32 1, %s1341_s15  }
 0x4a2   : > { %p1098_p0 = pnand %p1039_p12, %p1457_p11  ;;  %s898_s27 = scalar_lea.sflag [#allocation8], %s897_s21 }
 0x4a4   : > { %p1099_p1 = pneg %p1098_p0 }
 0x4a6   : > { %1336 = dma.done.wait (%p1099_p1), %s898_s27, 128  }
 0x4a7   : > { %1338 = vsyncadd (%p1099_p1), %s898_s27, 4294967168  ;;  %s23_s20 = sadd.s32 1, %s1677_s23   ;;  %s1678_s30 = sld [smem:[#allocation16_spill]] }
 0x4a8   : > { %p20_p2 = scmp.ge.s32.totalorder %s23_s20, 4   ;;  %s1679_s17 = sld [smem:[#allocation20_spill]] }
 0x4a9   : > { %s1680_s18 = sld [smem:[#allocation17_spill]]  ;;  %s1682_s15 = smov %s1345_s16 }
 0x4aa   : > { %s1681_s19 = sld [smem:[#allocation19_spill]]  ;;  %22 = sbr.rel (!%p20_p2) target bundleno = 10 (0xa), region = 134 }
 0x4ad   : > { %s1683_s16 = smov %s1678_s30 }
 0x4af   :  { %904 = vsyncpa [#allocation7], 1 }
 0x4b0   :  { %906 = vsyncpa [#allocation7 + $0x1], 1 }
 0x4b1   :  { %907 = vsyncpa [#allocation10], 1 }
 0x4b2   :  { %909 = vsyncpa [#allocation10 + $0x1], 1 }
 0x4b3   :  { %910 = vsyncpa [#allocation8], 1 }
 0x4b4   :  { %912 = vsyncpa [#allocation8 + $0x1], 1 }

</bundles_post_ra>
